<compile_context>
chip_gen: v5e
topology: v5e:2x2
jax: 0.10.0
libtpu: 0.0.40
codegen_flags: <defaults>
</compile_context>

<pallas_src>
import functools

import jax
import jax.numpy as jnp
from jax.experimental import pallas as pl
from jax.experimental.pallas import tpu as pltpu


def _att_kernel(x_ref, w1_ref, a1_ref, w2_ref, bn_s_ref, bn_b_ref,
                out_ref, acc_ref, *, hw_total, spatial_tile):
    k = pl.program_id(1)

    @pl.when(k == 0)
    def _init():
        acc_ref[...] = jnp.zeros_like(acc_ref)

    # ---- partial spatial sum (sublane reduce; channels stay on lanes) ------
    start = k * spatial_tile
    row = jax.lax.broadcasted_iota(jnp.int32, (spatial_tile, 1), 0) + start
    valid = row < hw_total                               # mask padded tail rows
    xt = x_ref[...].astype(jnp.float32)                  # (bt, st, c)
    xt = jnp.where(valid[None, :, :], xt, 0.0)
    acc_ref[...] += jnp.sum(xt, axis=1)                  # (bt, c)

    # ---- finalize once: avg-pool -> 1x1 conv -> PReLU -> 1x1 conv -> BN -> sigmoid
    @pl.when(k == pl.num_programs(1) - 1)
    def _finalize():
        y = acc_ref[...] * (1.0 / float(hw_total))       # global average pool
        h = jnp.dot(y, w1_ref[...], preferred_element_type=jnp.float32)
        a = a1_ref[...]                                  # (1, outc) PReLU slopes
        h = jnp.where(h >= 0.0, h, a * h)                # PReLU
        g = jnp.dot(h, w2_ref[...], preferred_element_type=jnp.float32)
        g = g * bn_s_ref[...] + bn_b_ref[...]            # folded inference BN
        out_ref[...] = jax.nn.sigmoid(g).astype(out_ref.dtype)


def att_forward_nhwc(x_nhwc, w1, prelu_a, w2, bn_scale, bn_shift,
                     *, spatial_tile=None, batch_tile=None,
                     vmem_tile_budget_bytes=4 << 20):
    """x_nhwc: (b, h, w, c) channel-last. Returns sigmoid gate (b, outc, 1, 1)."""
    b, h, w, c = x_nhwc.shape
    hw = h * w
    outc = w1.shape[1]
    x_flat = x_nhwc.reshape(b, hw, c)

    # Batch tile: full batch if small, otherwise sublane-aligned chunks of 8.
    bt = batch_tile if batch_tile is not None else (b if b <= 8 else 8)
    bt = min(bt, b)

    # Spatial tile: largest multiple of 8 whose x-tile fits the VMEM budget
    # (or the full extent when it already fits). Partial tails are masked.
    if spatial_tile is None:
        budget = vmem_tile_budget_bytes // max(1, bt * c * x_flat.dtype.itemsize)
        if budget >= hw:
            spatial_tile = hw
        else:
            spatial_tile = max(8, (budget // 8) * 8)
    st = int(spatial_tile)

    grid = (pl.cdiv(b, bt), pl.cdiv(hw, st))
    kernel = functools.partial(_att_kernel, hw_total=hw, spatial_tile=st)

    # Advisory: this op is HBM-bandwidth bound on reading x.
    cost = pl.CostEstimate(
        flops=int(b * hw * c + 2 * b * c * outc + 2 * b * outc * outc),
        transcendentals=int(b * outc),
        bytes_accessed=int(
            x_flat.size * x_flat.dtype.itemsize
            + (w1.size + w2.size + prelu_a.size + bn_scale.size + bn_shift.size) * 4
            + b * outc * 4),
    )

    out = pl.pallas_call(
        kernel,
        out_shape=jax.ShapeDtypeStruct((b, outc), jnp.float32),
        grid_spec=pltpu.PrefetchScalarGridSpec(
            num_scalar_prefetch=0,
            grid=grid,
            in_specs=[
                pl.BlockSpec((bt, st, c), lambda i, k: (i, k, 0)),   # x tile
                pl.BlockSpec((c, outc), lambda i, k: (0, 0)),        # w1 (VMEM resident)
                pl.BlockSpec((1, outc), lambda i, k: (0, 0)),        # PReLU slope
                pl.BlockSpec((outc, outc), lambda i, k: (0, 0)),     # w2 (VMEM resident)
                pl.BlockSpec((1, outc), lambda i, k: (0, 0)),        # BN scale
                pl.BlockSpec((1, outc), lambda i, k: (0, 0)),        # BN shift
            ],
            out_specs=pl.BlockSpec((bt, outc), lambda i, k: (i, 0)),
            scratch_shapes=[pltpu.VMEM((bt, c), jnp.float32)],       # running sum
        ),
        compiler_params=pltpu.CompilerParams(
            dimension_semantics=("parallel", "arbitrary"),
        ),
        cost_estimate=cost,
    )(x_flat, w1, prelu_a, w2, bn_scale, bn_shift)

    return out.reshape(b, outc, 1, 1)


def att_forward(x_nchw, w1, prelu_a, w2, bn_scale, bn_shift, **kwargs):
    """PyTorch-layout (NCHW) convenience wrapper.

    NOTE: on TPU the feature map would normally already live channel-last; this
    transpose is pure layout plumbing for parity with the PyTorch module.
    """
    x_nhwc = jnp.transpose(x_nchw, (0, 2, 3, 1))
    return att_forward_nhwc(x_nhwc, w1, prelu_a, w2, bn_scale, bn_shift, **kwargs)


def init_att_params(key, inc, outc, bn_eps=1e-5):
    """Deterministic init mirroring the module's init_weight()."""
    k1, k2 = jax.random.split(key, 2)
    # kaiming_normal_(a=1): std = sqrt(2 / (1 + a^2) / fan_in) = 1/sqrt(fan_in).
    # Stored as (in_features, out_features) so the kernel does y @ W directly.
    w1 = jax.random.normal(k1, (inc, outc), jnp.float32) * (1.0 / (inc ** 0.5))
    w2 = jax.random.normal(k2, (outc, outc), jnp.float32) * (1.0 / (outc ** 0.5))
    prelu_a = jnp.full((1, outc), 0.25, jnp.float32)          # nn.PReLU default
    # TODO(synk): BatchNorm2d is folded as inference-mode scale/shift (gamma=1,
    # beta=0, running stats 0/1); training-mode batch statistics are not modeled.
    gamma = jnp.ones((outc,), jnp.float32)
    beta = jnp.zeros((outc,), jnp.float32)
    running_mean = jnp.zeros((outc,), jnp.float32)
    running_var = jnp.ones((outc,), jnp.float32)
    bn_scale = (gamma / jnp.sqrt(running_var + bn_eps)).reshape(1, outc)
    bn_shift = (beta - running_mean * bn_scale[0]).reshape(1, outc)
    return w1, prelu_a, w2, bn_scale, bn_shift


if __name__ == "__main__":
    batch, inc, spatial, outc = 2, 4, 16, 8   # hw = 256

    key = jax.random.PRNGKey(0)
    kx, kp = jax.random.split(key)
    x = jax.random.normal(kx, (batch, inc, spatial, spatial), jnp.float32)
    w1, prelu_a, w2, bn_scale, bn_shift = init_att_params(kp, inc, outc)

    # Explicit small spatial tile (64) so the grid/accumulator pipeline is
    # actually exercised (4 reduction steps) at this toy size.
    y = att_forward(x, w1, prelu_a, w2, bn_scale, bn_shift, spatial_tile=64)
    jax.block_until_ready(y)

    # Pure-JAX reference of the same math.
    y_ref = jnp.mean(x, axis=(2, 3))                       # global avg pool
    h_ref = y_ref @ w1                                     # 1x1 conv, no bias
    h_ref = jnp.where(h_ref >= 0.0, h_ref, prelu_a * h_ref)   # PReLU
    g_ref = h_ref @ w2                                     # 1x1 conv, no bias
    g_ref = g_ref * bn_scale + bn_shift                    # folded BN
    g_ref = jax.nn.sigmoid(g_ref).reshape(batch, outc, 1, 1)

    assert y.shape == (batch, outc, 1, 1)
    assert jnp.allclose(y, g_ref, atol=1e-5, rtol=1e-5), (
        float(jnp.max(jnp.abs(y - g_ref))))
    print("KERNEL_OK")
</pallas_src>

<mosaic_0001>
module attributes {stable_mosaic.version = 11 : i64} {
  func.func @_att_kernel(%arg0: i32, %arg1: i32, %arg2: memref<2x64x4xf32, #tpu.memory_space<vmem>>, %arg3: memref<4x8xf32, #tpu.memory_space<vmem>>, %arg4: memref<1x8xf32, #tpu.memory_space<vmem>>, %arg5: memref<8x8xf32, #tpu.memory_space<vmem>>, %arg6: memref<1x8xf32, #tpu.memory_space<vmem>>, %arg7: memref<1x8xf32, #tpu.memory_space<vmem>>, %arg8: memref<2x8xf32, #tpu.memory_space<vmem>>, %arg9: memref<2x4xf32, #tpu.memory_space<vmem>>) attributes {dimension_semantics = [#tpu.dimension_semantics<parallel>, #tpu.dimension_semantics<arbitrary>], iteration_bounds = array<i64: 1, 4>, scalar_prefetch = 0 : i64, scratch_operands = 1 : i64, tpu.core_type = #tpu.core_type<tc>, window_params = [{transform_indices = @transform_0, window_bounds = array<i64: 2, 64, 4>}, {pipeline_mode = #tpu.pipeline_mode<synchronous>, transform_indices = @transform_1, window_bounds = array<i64: 4, 8>}, {pipeline_mode = #tpu.pipeline_mode<synchronous>, transform_indices = @transform_2, window_bounds = array<i64: 1, 8>}, {pipeline_mode = #tpu.pipeline_mode<synchronous>, transform_indices = @transform_3, window_bounds = array<i64: 8, 8>}, {pipeline_mode = #tpu.pipeline_mode<synchronous>, transform_indices = @transform_4, window_bounds = array<i64: 1, 8>}, {pipeline_mode = #tpu.pipeline_mode<synchronous>, transform_indices = @transform_5, window_bounds = array<i64: 1, 8>}, {transform_indices = @transform_6, window_bounds = array<i64: 2, 8>}]} {
    %c0_i32 = arith.constant 0 : i32
    %0 = arith.cmpi eq, %arg1, %c0_i32 : i32
    %1 = arith.extui %0 : i1 to i32
    %c0_i32_0 = arith.constant 0 : i32
    %2 = arith.cmpi ne, %1, %c0_i32_0 : i32
    scf.if %2 {
      %cst_9 = arith.constant 0.000000e+00 : f32
      %22 = vector.broadcast %cst_9 : f32 to vector<2x4xf32>
      %c0_10 = arith.constant 0 : index
      %c0_11 = arith.constant 0 : index
      %23 = vector.load %arg9[%c0_10, %c0_11] : memref<2x4xf32, #tpu.memory_space<vmem>>, vector<2x4xf32>
      tpu.vector_store %arg9[%c0_10, %c0_11], %22 {strides = array<i32>} : memref<2x4xf32, #tpu.memory_space<vmem>>, vector<2x4xf32>,
    } else {
    }
    %c64_i32 = arith.constant 64 : i32
    %3 = arith.muli %arg1, %c64_i32 : i32
    %4 = tpu.iota {dimensions = array<i32: 0>} : vector<64x1xi32>
    %5 = vector.broadcast %3 : i32 to vector<64x1xi32>
    %6 = arith.addi %4, %5 : vector<64x1xi32>
    %c256_i32 = arith.constant 256 : i32
    %7 = vector.broadcast %c256_i32 : i32 to vector<64x1xi32>
    %8 = arith.cmpi slt, %6, %7 : vector<64x1xi32>
    %c0 = arith.constant 0 : index
    %c0_1 = arith.constant 0 : index
    %c0_2 = arith.constant 0 : index
    %9 = vector.load %arg2[%c0, %c0_1, %c0_2] : memref<2x64x4xf32, #tpu.memory_space<vmem>>, vector<2x64x4xf32>
    %10 = vector.shape_cast %8 : vector<64x1xi1> to vector<1x64x1xi1>
    %cst = arith.constant 0.000000e+00 : f32
    %11 = vector.shape_cast %10 : vector<1x64x1xi1> to vector<1x64x1xi1>
    %12 = vector.broadcast %11 : vector<1x64x1xi1> to vector<2x64x4xi1>
    %13 = vector.broadcast %cst : f32 to vector<2x64x4xf32>
    %14 = arith.select %12, %9, %13 : vector<2x64x4xi1>, vector<2x64x4xf32>
    %c0_3 = arith.constant 0 : index
    %c0_4 = arith.constant 0 : index
    %15 = vector.load %arg9[%c0_3, %c0_4] : memref<2x4xf32, #tpu.memory_space<vmem>>, vector<2x4xf32>
    %cst_5 = arith.constant dense<0.000000e+00> : vector<2x4xf32>
    %16 = vector.multi_reduction <add>, %14, %cst_5 [1] : vector<2x64x4xf32> to vector<2x4xf32>
    %17 = arith.addf %15, %16 : vector<2x4xf32>
    %c0_6 = arith.constant 0 : index
    %c0_7 = arith.constant 0 : index
    %18 = vector.load %arg9[%c0_6, %c0_7] : memref<2x4xf32, #tpu.memory_space<vmem>>, vector<2x4xf32>
    tpu.vector_store %arg9[%c0_6, %c0_7], %17 {strides = array<i32>} : memref<2x4xf32, #tpu.memory_space<vmem>>, vector<2x4xf32>,
    %c3_i32 = arith.constant 3 : i32
    %19 = arith.cmpi eq, %arg1, %c3_i32 : i32
    %20 = arith.extui %19 : i1 to i32
    %c0_i32_8 = arith.constant 0 : i32
    %21 = arith.cmpi ne, %20, %c0_i32_8 : i32
    scf.if %21 {
      %c0_9 = arith.constant 0 : index
      %c0_10 = arith.constant 0 : index
      %22 = vector.load %arg9[%c0_9, %c0_10] : memref<2x4xf32, #tpu.memory_space<vmem>>, vector<2x4xf32>
      %cst_11 = arith.constant 3.906250e-03 : f32
      %23 = vector.broadcast %cst_11 : f32 to vector<2x4xf32>
      %24 = arith.mulf %22, %23 : vector<2x4xf32>
      %c0_12 = arith.constant 0 : index
      %c0_13 = arith.constant 0 : index
      %25 = vector.load %arg3[%c0_12, %c0_13] : memref<4x8xf32, #tpu.memory_space<vmem>>, vector<4x8xf32>
      %cst_14 = arith.constant dense<0.000000e+00> : vector<2x8xf32>
      %26 = tpu.matmul %24, %25, %cst_14 {dimension_numbers = #tpu.dot_dimension_numbers<[1], [0], [0], [1], [0, 0, 1, 1], [], []>} : vector<2x4xf32>, vector<4x8xf32>, vector<2x8xf32> -> vector<2x8xf32>
      %c0_15 = arith.constant 0 : index
      %c0_16 = arith.constant 0 : index
      %27 = vector.load %arg4[%c0_15, %c0_16] : memref<1x8xf32, #tpu.memory_space<vmem>>, vector<1x8xf32>
      %cst_17 = arith.constant 0.000000e+00 : f32
      %28 = vector.broadcast %cst_17 : f32 to vector<2x8xf32>
      %29 = arith.cmpf oge, %26, %28 : vector<2x8xf32>
      %30 = vector.broadcast %27 : vector<1x8xf32> to vector<2x8xf32>
      %31 = arith.mulf %30, %26 : vector<2x8xf32>
      %32 = arith.select %29, %26, %31 : vector<2x8xi1>, vector<2x8xf32>
      %c0_18 = arith.constant 0 : index
      %c0_19 = arith.constant 0 : index
      %33 = vector.load %arg5[%c0_18, %c0_19] : memref<8x8xf32, #tpu.memory_space<vmem>>, vector<8x8xf32>
      %cst_20 = arith.constant dense<0.000000e+00> : vector<2x8xf32>
      %34 = tpu.matmul %32, %33, %cst_20 {dimension_numbers = #tpu.dot_dimension_numbers<[1], [0], [0], [1], [0, 0, 1, 1], [], []>} : vector<2x8xf32>, vector<8x8xf32>, vector<2x8xf32> -> vector<2x8xf32>
      %c0_21 = arith.constant 0 : index
      %c0_22 = arith.constant 0 : index
      %35 = vector.load %arg6[%c0_21, %c0_22] : memref<1x8xf32, #tpu.memory_space<vmem>>, vector<1x8xf32>
      %36 = vector.broadcast %35 : vector<1x8xf32> to vector<2x8xf32>
      %37 = arith.mulf %34, %36 : vector<2x8xf32>
      %c0_23 = arith.constant 0 : index
      %c0_24 = arith.constant 0 : index
      %38 = vector.load %arg7[%c0_23, %c0_24] : memref<1x8xf32, #tpu.memory_space<vmem>>, vector<1x8xf32>
      %39 = vector.broadcast %38 : vector<1x8xf32> to vector<2x8xf32>
      %40 = arith.addf %37, %39 : vector<2x8xf32>
      %41 = arith.negf %40 : vector<2x8xf32>
      %42 = math.exp %41 : vector<2x8xf32>
      %cst_25 = arith.constant 1.000000e+00 : f32
      %43 = vector.broadcast %cst_25 : f32 to vector<2x8xf32>
      %44 = arith.addf %43, %42 : vector<2x8xf32>
      %45 = arith.divf %43, %44 : vector<2x8xf32>
      %c0_26 = arith.constant 0 : index
      %c0_27 = arith.constant 0 : index
      %46 = vector.load %arg8[%c0_26, %c0_27] : memref<2x8xf32, #tpu.memory_space<vmem>>, vector<2x8xf32>
      tpu.vector_store %arg8[%c0_26, %c0_27], %45 {strides = array<i32>} : memref<2x8xf32, #tpu.memory_space<vmem>>, vector<2x8xf32>,
    } else {
    }
    return
  }
  func.func @transform_0(%arg0: i32, %arg1: i32) -> (i32, i32, i32) {
    %c0_i32 = arith.constant 0 : i32
    %c0_i32_0 = arith.constant 0 : i32
    return %arg0, %arg1, %c0_i32 : i32, i32, i32
  }
  func.func @transform_1(%arg0: i32, %arg1: i32) -> (i32, i32) {
    %c0_i32 = arith.constant 0 : i32
    %c0_i32_0 = arith.constant 0 : i32
    %c0_i32_1 = arith.constant 0 : i32
    return %c0_i32, %c0_i32_0 : i32, i32
  }
  func.func @transform_2(%arg0: i32, %arg1: i32) -> (i32, i32) {
    %c0_i32 = arith.constant 0 : i32
    %c0_i32_0 = arith.constant 0 : i32
    %c0_i32_1 = arith.constant 0 : i32
    return %c0_i32, %c0_i32_0 : i32, i32
  }
  func.func @transform_3(%arg0: i32, %arg1: i32) -> (i32, i32) {
    %c0_i32 = arith.constant 0 : i32
    %c0_i32_0 = arith.constant 0 : i32
    %c0_i32_1 = arith.constant 0 : i32
    return %c0_i32, %c0_i32_0 : i32, i32
  }
  func.func @transform_4(%arg0: i32, %arg1: i32) -> (i32, i32) {
    %c0_i32 = arith.constant 0 : i32
    %c0_i32_0 = arith.constant 0 : i32
    %c0_i32_1 = arith.constant 0 : i32
    return %c0_i32, %c0_i32_0 : i32, i32
  }
  func.func @transform_5(%arg0: i32, %arg1: i32) -> (i32, i32) {
    %c0_i32 = arith.constant 0 : i32
    %c0_i32_0 = arith.constant 0 : i32
    %c0_i32_1 = arith.constant 0 : i32
    return %c0_i32, %c0_i32_0 : i32, i32
  }
  func.func @transform_6(%arg0: i32, %arg1: i32) -> (i32, i32) {
    %c0_i32 = arith.constant 0 : i32
    %c0_i32_0 = arith.constant 0 : i32
    return %arg0, %c0_i32 : i32, i32
  }
}

</mosaic_0001>

<bundles_post_ra>
// kernel: tpu_custom_call.1
= control target key start
LH: loop header
LB: loop body
LE: loop exit
PB: predicated region body
PF: predicated region fallthrough
CT: control target
= control target key end

     0   :  { %11 = vsyncpa [#allocation5], 0  ;;  %s842_s21 = smov 0   ;;  %s844_s22 = smov 0   ;;  %s996_s0 = inlined_call_operand.vmem [shape: f32[2,256,4], index: 0, kind: input, shape index: {}]   ;;  %s997_s1 = inlined_call_operand.vmem [shape: f32[4,8], index: 1, kind: input, shape index: {}]   ;;  %s998_s2 = inlined_call_operand.vmem [shape: f32[1,8], index: 2, kind: input, shape index: {}]   ;;  %s999_s3 = inlined_call_operand.vmem [shape: f32[8,8], index: 3, kind: input, shape index: {}]   ;;  %s1000_s4 = inlined_call_operand.vmem [shape: f32[1,8], index: 4, kind: input, shape index: {}]   ;;  %s1001_s5 = inlined_call_operand.vmem [shape: f32[1,8], index: 5, kind: input, shape index: {}]   ;;  %s1002_s6 = inlined_call_operand.hbm [shape: f32[2,8], index: 6, kind: output, shape index: {}]  }
   0x1   :  { %s846_s23 = smov 0   ;;  %s848_s24 = smov 0  }
   0x2   :  { %s850_s25 = smov 0  }
   0x3 LB: > { %s658_s26 = sadd.s32 4294967295, %s803_s25   ;;  %s26_s27 = sadd.s32 1, %s799_s24  ;;  %s803_s25 = sphi %s850_s25, %s17_s25   ;;  %s799_s24 = sphi %s848_s24, %s1006_s24   ;;  %s795_s23 = sphi %s846_s23, %s1005_s23   ;;  %s791_s22 = sphi %s844_s22, %s1004_s22   ;;  %s787_s21 = sphi %s842_s21, %s1003_s21  }
   0x4   : > { %p27_p0 = scmp.ge.s32.totalorder %s26_s27, 4  ;;  %p45_p1 = scmp.ne.s32.totalorder %s791_s22, %s787_s21 }
   0x5   : > { %p46_p2 = scmp.eq.s32.totalorder %s803_s25, 0  ;;  %s38_s29 = sadd.s32 1, %s791_s22 }
   0x6   : > { %s1008_s27 = smov (%p27_p0, %s26_s27), 0  ;;  %p660_p5 = scmp.ge.s32.totalorder %s803_s25, 4 }
   0x7   : > { %p47_p3 = por %p46_p2, %p45_p1  ;;  %s34_s28 = ssub.s32 %s799_s24, %s1008_s27 }
   0x8   : > { %p36_p4 = scmp.eq.s32.totalorder %s34_s28, 0  ;;  %217 = sbr.rel (%p660_p5) target bundleno = 33 (0x21), region = 36 }
   0xa   : > { %s878_s30 = scalar_select %p36_p4, %s791_s22, %s38_s29  }
   0xd   : > { %220 = sbr.rel (!%p47_p3) target bundleno = 33 (0x21), region = 40  ;;  %s222_s7 = sand.u32 (%p47_p3), 1, %s791_s22  }
   0xe   : > { %s677_s8 = sshll.u32 (%p47_p3), %s799_s24, 6  ;;  %s661_s9 = sshll.u32 (%p47_p3), %s222_s7, 7 }
   0xf   : > { %s886_s12 = scalar_lea.vmem (%p47_p3), %s996_s0, %s677_s8  ;;  %s224_s13 = scalar_lea.vmem (%p47_p3), [#allocation3], %s661_s9 }
  0x10   : > { %v289_v0 = vld [vmem:[%s886_s12] sm:$0xff] (%p47_p3)  ;;  %v291_v1 = vld [vmem:[%s886_s12 + $0x8] sm:$0xff] (%p47_p3)  ;;  %v293_v2 = vld [vmem:[%s886_s12 + $0x10] sm:$0xff] (%p47_p3) }
  0x11   : > { %290 = vst [vmem:[%s224_s13] sm:$0xff] (%p47_p3), %v289_v0  ;;  %v295_v3 = vld [vmem:[%s886_s12 + $0x18] sm:$0xff] (%p47_p3)  ;;  %v297_v4 = vld [vmem:[%s886_s12 + $0x20] sm:$0xff] (%p47_p3)  ;;  %v299_v5 = vld [vmem:[%s886_s12 + $0x28] sm:$0xff] (%p47_p3) }
  0x12   : > { %292 = vst [vmem:[%s224_s13 + $0x8] sm:$0xff] %v291_v1  ;;  %v301_v6 = vld [vmem:[%s886_s12 + $0x30] sm:$0xff]  ;;  %v303_v7 = vld [vmem:[%s886_s12 + $0x38] sm:$0xff]  ;;  %v305_v8 = vld [vmem:[%s886_s12 + $0x100] sm:$0xff] }
  0x13   : > { %294 = vst [vmem:[%s224_s13 + $0x10] sm:$0xff] %v293_v2  ;;  %v307_v9 = vld [vmem:[%s886_s12 + $0x108] sm:$0xff]  ;;  %v309_v10 = vld [vmem:[%s886_s12 + $0x110] sm:$0xff]  ;;  %v311_v11 = vld [vmem:[%s886_s12 + $0x118] sm:$0xff] }
  0x14   : > { %296 = vst [vmem:[%s224_s13 + $0x18] sm:$0xff] %v295_v3  ;;  %v313_v12 = vld [vmem:[%s886_s12 + $0x120] sm:$0xff]  ;;  %v315_v13 = vld [vmem:[%s886_s12 + $0x128] sm:$0xff]  ;;  %v317_v14 = vld [vmem:[%s886_s12 + $0x130] sm:$0xff] }
  0x15   : > { %298 = vst [vmem:[%s224_s13 + $0x20] sm:$0xff] %v297_v4  ;;  %v319_v15 = vld [vmem:[%s886_s12 + $0x138] sm:$0xff] }
  0x16   : > { %300 = vst [vmem:[%s224_s13 + $0x28] sm:$0xff] %v299_v5 }
  0x17   : > { %302 = vst [vmem:[%s224_s13 + $0x30] sm:$0xff] %v301_v6 }
  0x18   : > { %304 = vst [vmem:[%s224_s13 + $0x38] sm:$0xff] %v303_v7 }
  0x19   : > { %306 = vst [vmem:[%s224_s13 + $0x40] sm:$0xff] %v305_v8 }
  0x1a   : > { %308 = vst [vmem:[%s224_s13 + $0x48] sm:$0xff] %v307_v9 }
  0x1b   : > { %310 = vst [vmem:[%s224_s13 + $0x50] sm:$0xff] %v309_v10 }
  0x1c   : > { %312 = vst [vmem:[%s224_s13 + $0x58] sm:$0xff] %v311_v11 }
  0x1d   : > { %314 = vst [vmem:[%s224_s13 + $0x60] sm:$0xff] %v313_v12 }
  0x1e   : > { %316 = vst [vmem:[%s224_s13 + $0x68] sm:$0xff] %v315_v13 }
  0x1f   : > { %318 = vst [vmem:[%s224_s13 + $0x70] sm:$0xff] %v317_v14 }
  0x20   : > { %320 = vst [vmem:[%s224_s13 + $0x78] sm:$0xff] %v319_v15 }
  0x21 PF: > { %p664_p6 = scmp.ge.s32.totalorder %s803_s25, 1  ;;  %p325_p7 = scmp.lt.s32.totalorder %s803_s25, 5 }
  0x23   : > { %p326_p8 = pnand %p664_p6, %p325_p7 }
  0x24   : > { %s332_s14 = sand.u32 (!%p326_p8), 1, %s787_s21   ;;  %p666_p9 = scmp.ne.s32.totalorder (!%p326_p8), %s795_s23, 0 }
  0x25   : > { %329 = sbr.rel (%p326_p8) target bundleno = 396 (0x18c), region = 78  ;;  %s665_s15 = sshll.u32 (!%p326_p8), %s332_s14, 7 }
  0x26   : > { %s907_s16 = scalar_lea.vmem (!%p326_p8), [#allocation3], %s665_s15 }
  0x2a   : > { %361 = sbr.rel (%p666_p9) target bundleno = 49 (0x31), region = 86 }
  0x2f   : > { %vm362_vm0 = vcmask 25600   ;;  %v805_v16 = vmov 0.0  }
  0x30   : > { %363 = vst.msk [vmem:[#allocation2] sm:$0x3] %vm362_vm0, %v805_v16 }
  0x31 PF: > { %s667_s17 = sshll.u32 %s795_s23, 6  ;;  %v365_v17 = vlaneseq  ;;  %v391_v30 = vld [vmem:[%s907_s16] sm:$0xff]  ;;  %v392_v32 = vld [vmem:[%s907_s16 + $0x8] sm:$0xff]  ;;  %v393_v33 = vld [vmem:[%s907_s16 + $0x10] sm:$0xff]  ;;  %vm440_vm5 = vcmask 31744   ;;  %vm485_vm10 = vcmask 1041409  }
  0x32   : > { %v374_v19 = vstv %s667_s17  ;;  %v394_v34 = vld [vmem:[%s907_s16 + $0x18] sm:$0xff]  ;;  %v399_v37 = vld [vmem:[%s907_s16 + $0x40] sm:$0xff]  ;;  %v400_v38 = vld [vmem:[%s907_s16 + $0x48] sm:$0xff]  ;;  %vm489_vm11 = vcmask 25600   ;;  %p668_p10 = scmp.ne.s32.totalorder %s795_s23, 3 }
  0x33   : > { %v366_v18 = vshrl.u32 %v365_v17, 7  ;;  %v401_v39 = vld [vmem:[%s907_s16 + $0x50] sm:$0xff]  ;;  %v395_v44 = vld [vmem:[%s907_s16 + $0x20] sm:$0xff]  ;;  %v402_v45 = vld [vmem:[%s907_s16 + $0x58] sm:$0xff] }
  0x34   : > { %v396_v52 = vld [vmem:[%s907_s16 + $0x28] sm:$0xff]  ;;  %v403_v53 = vld [vmem:[%s907_s16 + $0x60] sm:$0xff]  ;;  %v397_v59 = vld [vmem:[%s907_s16 + $0x30] sm:$0xff] }
  0x35   : > { %v367_v20 = vadd.s32 8, %v366_v18  ;;  %v368_v21 = vadd.s32 16, %v366_v18  ;;  %v369_v22 = vadd.s32 24, %v366_v18  ;;  %v370_v23 = vadd.s32 32, %v366_v18  ;;  %v404_v60 = vld [vmem:[%s907_s16 + $0x68] sm:$0xff]  ;;  %v398_v5 = vld [vmem:[%s907_s16 + $0x38] sm:$0xff] }
  0x36   : > { %v375_v24 = vadd.s32 %v374_v19, %v366_v18  ;;  %v371_v25 = vadd.s32 40, %v366_v18  ;;  %v372_v29 = vadd.s32 48, %v366_v18  ;;  %v373_v35 = vadd.s32 56, %v366_v18  ;;  %v405_v6 = vld [vmem:[%s907_s16 + $0x70] sm:$0xff]  ;;  %v406_v13 = vld [vmem:[%s907_s16 + $0x78] sm:$0xff] }
  0x37   : > { %v376_v26 = vadd.s32 %v374_v19, %v367_v20  ;;  %v377_v27 = vadd.s32 %v374_v19, %v368_v21  ;;  %v378_v28 = vadd.s32 %v374_v19, %v369_v22  ;;  %v379_v31 = vadd.s32 %v374_v19, %v370_v23 }
  0x38   : > { %vm383_vm1 = vcmp.lt.s32.totalorder %v375_v24, 256  ;;  %v380_v36 = vadd.s32 %v374_v19, %v371_v25  ;;  %v381_v41 = vadd.s32 %v374_v19, %v372_v29  ;;  %v382_v51 = vadd.s32 %v374_v19, %v373_v35 }
  0x39   : > { %vm384_vm2 = vcmp.lt.s32.totalorder %v376_v26, 256  ;;  %vm385_vm3 = vcmp.lt.s32.totalorder %v377_v27, 256  ;;  %vm386_vm4 = vcmp.lt.s32.totalorder %v378_v28, 256  ;;  %v423_v40 = vsel %vm383_vm1, %v391_v30, 0.0 }
  0x3a   : > { %v424_v42 = vsel %vm384_vm2, %v392_v32, 0.0  ;;  %v425_v43 = vsel %vm385_vm3, %v393_v33, 0.0  ;;  %vm387_vm6 = vcmp.lt.s32.totalorder %v379_v31, 256  ;;  %v426_v46 = vsel %vm386_vm4, %v394_v34, 0.0 }
  0x3b   : > { %v431_v47 = vsel %vm383_vm1, %v399_v37, 0.0  ;;  %v432_v48 = vsel %vm384_vm2, %v400_v38, 0.0  ;;  %v433_v49 = vsel %vm385_vm3, %v401_v39, 0.0  ;;  %v441_v50 = vsel %vm440_vm5, %v423_v40, 0.0 }
  0x3c   : > { %vm388_vm7 = vcmp.lt.s32.totalorder %v380_v36, 256  ;;  %v442_v54 = vsel %vm440_vm5, %v424_v42, 0.0  ;;  %v444_v55 = vsel %vm440_vm5, %v425_v43, 0.0  ;;  %vm389_vm8 = vcmp.lt.s32.totalorder %v381_v41, 256 }
  0x3d   : > { %v427_v56 = vsel %vm387_vm6, %v395_v44, 0.0  ;;  %v434_v57 = vsel %vm386_vm4, %v402_v45, 0.0  ;;  %v443_v58 = vadd.f32 %v442_v54, %v441_v50  ;;  %v446_v61 = vsel %vm440_vm5, %v426_v46, 0.0  ;;  %v439_v44 = vld [vmem:[#allocation2] sm:$0x3] }
  0x3e   : > { %v462_v62 = vsel %vm440_vm5, %v431_v47, 0.0  ;;  %v463_v63 = vsel %vm440_vm5, %v432_v48, 0.0  ;;  %v465_v0 = vsel %vm440_vm5, %v433_v49, 0.0  ;;  %v428_v1 = vsel %vm388_vm7, %v396_v52, 0.0 }
  0x3f   : > { %v435_v2 = vsel %vm387_vm6, %v403_v53, 0.0  ;;  %v445_v3 = vadd.f32 %v444_v55, %v443_v58  ;;  %v464_v4 = vadd.f32 %v463_v63, %v462_v62  ;;  %vm390_vm9 = vcmp.lt.s32.totalorder %v382_v51, 256 }
  0x40   : > { %v448_v7 = vsel %vm440_vm5, %v427_v56, 0.0  ;;  %v467_v8 = vsel %vm440_vm5, %v434_v57, 0.0  ;;  %v429_v9 = vsel %vm389_vm8, %v397_v59, 0.0  ;;  %v436_v10 = vsel %vm388_vm7, %v404_v60, 0.0 }
  0x41   : > { %v447_v11 = vadd.f32 %v446_v61, %v445_v3  ;;  %v466_v12 = vadd.f32 %v465_v0, %v464_v4  ;;  %v450_v14 = vsel %vm440_vm5, %v428_v1, 0.0  ;;  %v469_v15 = vsel %vm440_vm5, %v435_v2, 0.0 }
  0x42   : > { %v430_v16 = vsel %vm390_vm9, %v398_v5, 0.0  ;;  %v437_v17 = vsel %vm389_vm8, %v405_v6, 0.0  ;;  %v452_v20 = vsel %vm440_vm5, %v429_v9, 0.0  ;;  %v471_v21 = vsel %vm440_vm5, %v436_v10, 0.0 }
  0x43   : > { %v449_v18 = vadd.f32 %v448_v7, %v447_v11  ;;  %v468_v19 = vadd.f32 %v467_v8, %v466_v12  ;;  %v438_v22 = vsel %vm390_vm9, %v406_v13, 0.0  ;;  %v454_v25 = vsel %vm440_vm5, %v430_v16, 0.0 }
  0x44   : > { %v473_v26 = vsel %vm440_vm5, %v437_v17, 0.0  ;;  %v475_v29 = vsel %vm440_vm5, %v438_v22, 0.0 }
  0x45   : > { %v451_v23 = vadd.f32 %v450_v14, %v449_v18  ;;  %v470_v24 = vadd.f32 %v469_v15, %v468_v19 }
  0x47   : > { %v453_v27 = vadd.f32 %v452_v20, %v451_v23  ;;  %v472_v28 = vadd.f32 %v471_v21, %v470_v24 }
  0x49   : > { %v455_v30 = vadd.f32 %v454_v25, %v453_v27  ;;  %v474_v31 = vadd.f32 %v473_v26, %v472_v28 }
  0x4b   : > { %v456_v32 = vrot.slane %v455_v30, 4  ;;  %v476_v33 = vadd.f32 %v475_v29, %v474_v31 }
  0x4d   : > { %v457_v34 = vadd.f32 %v456_v32, %v455_v30  ;;  %v477_v35 = vrot.slane %v476_v33, 4 }
  0x4f   : > { %v458_v36 = vrot.slane %v457_v34, 2  ;;  %v478_v37 = vadd.f32 %v477_v35, %v476_v33 }
  0x51   : > { %v459_v38 = vadd.f32 %v458_v36, %v457_v34  ;;  %v479_v39 = vrot.slane %v478_v37, 2 }
  0x53   : > { %v460_v40 = vrot.slane %v459_v38, 1  ;;  %v480_v41 = vadd.f32 %v479_v39, %v478_v37 }
  0x55   : > { %v461_v42 = vadd.f32 %v460_v40, %v459_v38  ;;  %v481_v43 = vrot.slane %v480_v41, 1 }
  0x57   : > { %v482_v45 = vadd.f32 %v481_v43, %v480_v41 }
  0x58   : > { %494 = sbr.rel (%p668_p10) target bundleno = 390 (0x186), region = 90 }
  0x59   : > { %v486_v46 = vsel %vm485_vm10, %v482_v45, %v461_v42 }
  0x5a   : > { %v488_v47 = vadd.f32 %v486_v46, %v439_v44 }
  0x5c   : > { %490 = vst.msk [vmem:[#allocation2] sm:$0x3] %vm489_vm11, %v488_v47 }
  0x5d   : > { %v497_v48 = vld [vmem:[%s997_s1] sm:$0xf]  ;;  %vm501_vm12 = vcmask 1043456   ;;  %vm533_vm14 = vcmask 64512   ;;  %vm586_vm2 = vcmask 58368  }
  0x5e   : > { %669 = vmatpush.msk.msra.mxu0 %vm501_vm12, %v497_v48  ;;  %v532_v51 = vld [vmem:[%s999_s3] sm:$0xff] }
  0x5f   : > { %552 = vmatpush.msra.mxu1 %v532_v51  ;;  %v726_v52 = vld [vmem:[%s998_s2] ss:$0 sm:$0xff] }
  0x60   : > { %v727_v56 = vld [vmem:[%s1000_s4] ss:$0 sm:$0xff] }
  0x61   : > { %v728_v57 = vld [vmem:[%s1001_s5] ss:$0 sm:$0xff] }
  0x63   : > { %v495_v49 = vld [vmem:[#allocation2] sm:$0x3] }
  0x64   : > { %v496_v50 = vmul.f32 0.00390625, %v495_v49 }
  0x66   : > { %670 = vmatmul.msk.f32.vlgmr.msra.gmra.mxu0 %vm440_vm5, %v496_v50 }
  0xe3   : > { %v522_v53 = vpop.f32.mrf.mxu0 }
  0xe4   : > { %vm526_vm13 = vcmp.ge.f32.partialorder %v522_v53, 0.0  ;;  %v530_v54 = vmul.f32 %v726_v52, %v522_v53 }
  0xe6   : > { %v531_v55 = vsel %vm526_vm13, %v522_v53, %v530_v54 }
  0xe7   : > { %671 = vmatmul.msk.f32.vlgmr.msra.gmra.mxu1 %vm533_vm14, %v531_v55 }
 0x164   : > { %v554_v58 = vpop.f32.mrf.mxu1 }
 0x165   : > { %v561_v59 = vmul.f32 %v727_v56, %v554_v58 }
 0x167   : > { %v566_v60 = vadd.f32 %v728_v57, %v561_v59 }
 0x169   : > { %v672_v61 = vmul.f32 -1.442695, %v566_v60 }
 0x16b   : > { %729 = vpow2.f32 %v672_v61 }
 0x171   : > { %v730_v62 = vpop.eup %729 }
 0x172   : > { %v570_v63 = vadd.f32 1.0, %v730_v62 }
 0x174   : > { %731 = vrcp.f32 %v570_v63  ;;  %v582_v3 = vand.u32 2147483648, %v570_v63  ;;  %v580_v5 = vand.u32 2147483647, %v570_v63  ;;  %vm576_vm0 = vweird.f32 %v570_v63 }
 0x176   : > { %v583_v7 = vor.u32 1.1754944e-38, %v582_v3  ;;  %vm581_vm3 = vcmp.eq.f32.partialorder %v580_v5, 8.507059e+37 }
 0x17a   : > { %v732_v0 = vpop.eup %731 }
 0x17b   : > { %v572_v1 = vmul.f32 %v732_v0, %v570_v63  ;;  %vm577_vm15 = vweird.f32 %v732_v0 }
 0x17c   : > { %vm578_vm1 = vmor %vm576_vm0, %vm577_vm15 }
 0x17d   : > { %v573_v2 = vsub.f32 1.0, %v572_v1 }
 0x17f   : > { %v574_v4 = vmul.f32 %v732_v0, %v573_v2 }
 0x181   : > { %v575_v6 = vadd.f32 %v732_v0, %v574_v4 }
 0x183   : > { %v579_v8 = vsel %vm578_vm1, %v732_v0, %v575_v6 }
 0x184   : > { %v584_v9 = vsel %vm581_vm3, %v583_v7, %v579_v8 }
 0x185   : > { %587 = vst.msk [vmem:[#allocation4] sm:$0x3] %vm586_vm2, %v584_v9 }
 0x186 PF: > { %p682_p11 = scmp.eq.s32.totalorder %s658_s26, 3  ;;  %s598_s12 = sshll.u32 %s1002_s6, 4  ;;  %s599_s12 = int_to_ptr.hbm [resolvable:$true] %s598_s12 }
 0x187   : > { %s806_s13 = smov [#allocation4]  }
 0x188   : > { %s596_s14 = sshll.u32 %s806_s13, 4  ;;  %s597_s14 = int_to_ptr.vmem [resolvable:$true] %s596_s14 }
 0x189   : > { %679 = dma.vmem_to_hbm [thread:$0]  (%p682_p11), %s597_s14, 32, %s599_s12, [#allocation5]  }
 0x18a   : > { %782 = dma.done.wait (%p682_p11), [#allocation5], 32  }
 0x18b   : > { %784 = vsyncadd (%p682_p11), [#allocation5], 4294967264 }
 0x18c PF: > { %s17_s25 = sadd.s32 1, %s803_s25   ;;  %s1003_s21 = smov %s791_s22 }
 0x18d   : > { %p14_p12 = scmp.ge.s32.totalorder %s17_s25, 6   ;;  %s1004_s22 = smov %s878_s30 }
 0x18e   : > { %s1005_s23 = smov %s799_s24  ;;  %s1006_s24 = smov %s1008_s27 }
 0x18f   :  { %16 = sbr.rel (!%p14_p12) target bundleno = 3 (0x3), region = 123 }
 0x194   :  { %612 = vsyncpa [#allocation5], 1 }
 0x195   :  { %614 = vsyncpa [#allocation5 + $0x1], 1 }

</bundles_post_ra>
